<compile_context>
chip_gen: v7x
topology: tpu7x:2x2x1
jax: 0.10.0
libtpu: 0.0.40
codegen_flags: <defaults>
</compile_context>

<pallas_src>
import jax
import jax.numpy as jnp
from jax.experimental import pallas as pl
from jax.experimental.pallas import tpu as pltpu


def _mul_kernel(x_ref, attn_ref, out_ref):
    # Pure VPU elementwise multiply on a lane-dense VMEM tile.
    out_ref[...] = x_ref[...] * attn_ref[...]


def cross_attention(x, attention_scores, *, force_pallas=False):
    """out = x * attention_scores (same semantics as torch.mul for equal shapes)."""
    assert x.shape == attention_scores.shape, "inputs must share a shape"
    orig_shape = x.shape
    orig_dtype = x.dtype
    n = x.size
    itemsize = jnp.dtype(orig_dtype).itemsize

    # ---- Fast path: tiny tensors -------------------------------------------
    # Launch overhead dominates below ~1 MiB, and plain jnp lets XLA fuse the
    # multiply with adjacent ops (which the Pallas custom call would prevent).
    if not force_pallas and n * itemsize < (1 << 20):
        return x * attention_scores

    # ---- Lane-dense flattening, no padding on the common path ---------------
    lane = None
    for cand in (8192, 4096, 2048, 1024, 512, 256, 128):
        if n % cand == 0:
            lane = cand
            break

    if lane is None:
        # Rare fallback: n is not a multiple of 128 — pad the flat tail.
        lane = 128
        rows = pl.cdiv(n, lane)
        pad = rows * lane - n
        xf = jnp.pad(jnp.ravel(x), (0, pad))
        af = jnp.pad(jnp.ravel(attention_scores), (0, pad))
        needs_slice = True
    else:
        rows = n // lane
        xf = jnp.ravel(x)
        af = jnp.ravel(attention_scores)
        needs_slice = False

    x2 = xf.reshape(rows, lane)
    a2 = af.reshape(rows, lane)

    # ---- Tile-height selection ----------------------------------------------
    # ~2 MiB per block per array (12 MiB double-buffered total), rows a
    # multiple of 8, and >=4 grid steps for medium tensors so the pipeline
    # overlaps and both v7x TensorCores get work.
    MAX_TILE_BYTES = 2 * 1024 * 1024
    max_tile_rows = max(8, (MAX_TILE_BYTES // (lane * itemsize)) // 8 * 8)
    if rows <= 8:
        # Single full-extent block — exempt from the multiple-of-8 rule.
        tile_rows = rows
    else:
        want = -(-rows // 4)                       # cdiv(rows, 4)
        tile_rows = min(max_tile_rows, max(8, ((want + 7) // 8) * 8))

    grid = (pl.cdiv(rows, tile_rows),)             # partial last block is masked
    block = (tile_rows, lane)

    out2 = pl.pallas_call(
        _mul_kernel,
        out_shape=jax.ShapeDtypeStruct((rows, lane), orig_dtype),
        grid=grid,
        in_specs=[
            pl.BlockSpec(block, lambda i: (i, 0)),
            pl.BlockSpec(block, lambda i: (i, 0)),
        ],
        out_specs=pl.BlockSpec(block, lambda i: (i, 0)),
        compiler_params=pltpu.CompilerParams(
            dimension_semantics=("parallel",),
            # Actual use is ~12 MiB; explicit limit gives headroom for deeper
            # buffering while staying well inside v7x's 64 MiB/TC.
            vmem_limit_bytes=48 * 1024 * 1024,
        ),
    )(x2, a2)

    if needs_slice:
        return out2.reshape(-1)[:n].reshape(orig_shape)
    return out2.reshape(orig_shape)


if __name__ == "__main__":
    emb_size = 32          # module __init__ arg (metadata only; no params)
    batch, seq = 2, 8

    key = jax.random.PRNGKey(0)
    kx, ka, kx2, ka2 = jax.random.split(key, 4)

    # --- Test 1: module-sized input (2, 8, 32); force the Pallas path so the
    # kernel itself is exercised (default would take the tiny-input fast path).
    x = jax.random.normal(kx, (batch, seq, emb_size), dtype=jnp.float32)
    attention_scores = jax.random.uniform(
        ka, (batch, seq, emb_size), dtype=jnp.float32
    )
    out = jax.block_until_ready(cross_attention(x, attention_scores, force_pallas=True))
    ref = x * attention_scores
    assert out.shape == ref.shape and out.dtype == ref.dtype
    assert jnp.allclose(out, ref, atol=1e-6, rtol=1e-6)

    # Default path (fast path) must agree too.
    out_fast = jax.block_until_ready(cross_attention(x, attention_scores))
    assert jnp.allclose(out_fast, ref, atol=1e-6, rtol=1e-6)

    # --- Test 2: modest medium input to exercise the multi-block pipelined path.
    x2 = jax.random.normal(kx2, (4, 64, 512), dtype=jnp.float32)
    a2 = jax.random.uniform(ka2, (4, 64, 512), dtype=jnp.float32)
    out2 = jax.block_until_ready(cross_attention(x2, a2, force_pallas=True))
    ref2 = x2 * a2
    assert jnp.allclose(out2, ref2, atol=1e-6, rtol=1e-6)

    print("KERNEL_OK")
</pallas_src>

<mosaic_0001>
module attributes {stable_mosaic.version = 11 : i64} {
  func.func @_mul_kernel(%arg0: i32, %arg1: memref<1x512xf32, #tpu.memory_space<vmem>>, %arg2: memref<1x512xf32, #tpu.memory_space<vmem>>, %arg3: memref<1x512xf32, #tpu.memory_space<vmem>>) attributes {dimension_semantics = [#tpu.dimension_semantics<parallel>], iteration_bounds = array<i64: 1>, scalar_prefetch = 0 : i64, scratch_operands = 0 : i64, tpu.core_type = #tpu.core_type<tc>, window_params = [{transform_indices = @transform_0, window_bounds = array<i64: 1, 512>}, {transform_indices = @transform_1, window_bounds = array<i64: 1, 512>}, {transform_indices = @transform_2, window_bounds = array<i64: 1, 512>}]} {
    %c0 = arith.constant 0 : index
    %c0_0 = arith.constant 0 : index
    %0 = vector.load %arg1[%c0, %c0_0] : memref<1x512xf32, #tpu.memory_space<vmem>>, vector<1x512xf32>
    %c0_1 = arith.constant 0 : index
    %c0_2 = arith.constant 0 : index
    %1 = vector.load %arg2[%c0_1, %c0_2] : memref<1x512xf32, #tpu.memory_space<vmem>>, vector<1x512xf32>
    %2 = arith.mulf %0, %1 : vector<1x512xf32>
    %c0_3 = arith.constant 0 : index
    %c0_4 = arith.constant 0 : index
    %3 = vector.load %arg3[%c0_3, %c0_4] : memref<1x512xf32, #tpu.memory_space<vmem>>, vector<1x512xf32>
    tpu.vector_store %arg3[%c0_3, %c0_4], %2 {strides = array<i32>} : memref<1x512xf32, #tpu.memory_space<vmem>>, vector<1x512xf32>,
    return
  }
  func.func @transform_0(%arg0: i32) -> (i32, i32) {
    %c0_i32 = arith.constant 0 : i32
    %c0_i32_0 = arith.constant 0 : i32
    return %arg0, %c0_i32 : i32, i32
  }
  func.func @transform_1(%arg0: i32) -> (i32, i32) {
    %c0_i32 = arith.constant 0 : i32
    %c0_i32_0 = arith.constant 0 : i32
    return %arg0, %c0_i32 : i32, i32
  }
  func.func @transform_2(%arg0: i32) -> (i32, i32) {
    %c0_i32 = arith.constant 0 : i32
    %c0_i32_0 = arith.constant 0 : i32
    return %arg0, %c0_i32 : i32, i32
  }
}

</mosaic_0001>

<bundles_post_ra>
// kernel: tpu_custom_call.1
= control target key start
LH: loop header
LB: loop body
LE: loop exit
PB: predicated region body
PF: predicated region fallthrough
CT: control target
= control target key end

     0   :  { %7 = vsyncpa [#allocation3], 0  ;;  %s189_s0 = inlined_call_operand.hbm [shape: f32[1,512], index: 0, kind: input, shape index: {}]   ;;  %s190_s1 = inlined_call_operand.hbm [shape: f32[1,512], index: 1, kind: input, shape index: {}]   ;;  %s191_s2 = inlined_call_operand.hbm [shape: f32[1,512], index: 2, kind: output, shape index: {}]  }
   0x1   :  { %8 = vsyncpa [#allocation6], 0 }
   0x2   :  { %9 = vsyncpa [#allocation4], 0  ;;  %s135_s9 = smov [#allocation2]   ;;  %s136_s11 = smov [#allocation5]  }
   0x3   :  { %s16_s10 = sshll.u32 %s135_s9, 4  ;;  %s26_s12 = sshll.u32 %s136_s11, 4  ;;  %s17_s10 = int_to_ptr.vmem [resolvable:$true] %s16_s10  ;;  %s27_s12 = int_to_ptr.vmem [resolvable:$true] %s26_s12 }
   0x4   :  { %s63_s15 = scalar_lea.hbm %s189_s0, 64 }
   0x5   :  { %p64_p0 = scmp.ne.s32.totalorder %s189_s0, %s63_s15  ;;  %p67_p1 = scmp.lt.u32.totalorder %s63_s15, %s189_s0 }
   0x7   :  { %p69_p2 = pnand %p67_p1, %p64_p0 }
   0x9   :  { %72 = shalt.err (!%p69_p2)
}
   0xa   :  { %s73_s20 = scalar_lea.vmem %s17_s10, 64  ;;  %p78_p4 = scmp.lt.s32.totalorder %s17_s10, %s17_s10 }
   0xb   :  { %p74_p3 = scmp.ne.s32.totalorder %s17_s10, %s73_s20  ;;  %p79_p5 = scmp.lt.s32.totalorder %s73_s20, %s73_s20 }
   0xd   :  { %p80_p6 = por %p79_p5, %p78_p4 }
   0xf   :  { %p81_p7 = pnand %p80_p6, %p74_p3 }
  0x11   :  { %84 = shalt.err (!%p81_p7)
}
  0x12   :  { %19 = dma.hbm_to_vmem [thread:$0]  %s189_s0, 64, %s17_s10, [#allocation3]  }
  0x13   :  { %s85_s25 = scalar_lea.hbm %s190_s1, 64 }
  0x14   :  { %p86_p8 = scmp.ne.s32.totalorder %s190_s1, %s85_s25  ;;  %p89_p9 = scmp.lt.u32.totalorder %s85_s25, %s190_s1 }
  0x16   :  { %p91_p10 = pnand %p89_p9, %p86_p8 }
  0x18   :  { %94 = shalt.err (!%p91_p10)
}
  0x19   :  { %s95_s30 = scalar_lea.vmem %s27_s12, 64  ;;  %p100_p12 = scmp.lt.s32.totalorder %s27_s12, %s27_s12 }
  0x1a   :  { %p96_p11 = scmp.ne.s32.totalorder %s27_s12, %s95_s30  ;;  %p101_p13 = scmp.lt.s32.totalorder %s95_s30, %s95_s30 }
  0x1c   :  { %p102_p0 = por %p101_p13, %p100_p12 }
  0x1e   :  { %p103_p1 = pnand %p102_p0, %p96_p11 }
  0x20   :  { %106 = shalt.err (!%p103_p1)
}
  0x21   :  { %29 = dma.hbm_to_vmem [thread:$0]  %s190_s1, 64, %s27_s12, [#allocation6]  }
  0x22   :  { %129 = dma.done.wait [#allocation3], 64  }
  0x23   :  { %130 = vsyncadd [#allocation3], 4294967232 }
  0x24   :  { %131 = dma.done.wait [#allocation6], 64  }
  0x25   :  { %132 = vsyncadd [#allocation6], 4294967232  ;;  %v39_v0 = vlaneseq  ;;  %s137_s4 = smov [#allocation7]   ;;  %v36_v1 = vld [vmem:[#allocation2] sm:$0xf] }
  0x26   :  { %s50_s5 = sshll.u32 %s137_s4, 4  ;;  %v37_v2 = vld [vmem:[#allocation5] sm:$0xf]  ;;  %s51_s5 = int_to_ptr.vmem [resolvable:$true] %s50_s5 }
  0x27   :  { %vm41_vm0 = vcmp.lt.s32.totalorder %v39_v0, 512  ;;  %v38_v3 = vmul.f32 %v37_v2, %v36_v1  ;;  %s107_s6 = scalar_lea.vmem %s51_s5, 64  ;;  %p112_p3 = scmp.lt.s32.totalorder %s51_s5, %s51_s5 }
  0x28   :  { %p108_p2 = scmp.ne.s32.totalorder %s51_s5, %s107_s6  ;;  %p113_p4 = scmp.lt.s32.totalorder %s107_s6, %s107_s6 }
  0x29   :  { %43 = vst.msk [vmem:[#allocation7] sm:$0xf] %vm41_vm0, %v38_v3 }
  0x2a   :  { %p114_p5 = por %p113_p4, %p112_p3 }
  0x2c   :  { %p115_p6 = pnand %p114_p5, %p108_p2 }
  0x2e   :  { %118 = shalt.err (!%p115_p6)
}
  0x2f   :  { %s119_s8 = scalar_lea.hbm %s191_s2, 64 }
  0x30   :  { %p120_p7 = scmp.ne.s32.totalorder %s191_s2, %s119_s8  ;;  %p123_p8 = scmp.lt.u32.totalorder %s119_s8, %s191_s2 }
  0x32   :  { %p125_p9 = pnand %p123_p8, %p120_p7 }
  0x34   :  { %128 = shalt.err (!%p125_p9)
}
  0x35   :  { %53 = dma.vmem_to_hbm [thread:$0]  %s51_s5, 64, %s191_s2, [#allocation4]  }
  0x36   :  { %133 = dma.done.wait [#allocation4], 64  }
  0x37   :  { %134 = vsyncadd [#allocation4], 4294967232 }
  0x38   :  { %57 = vsyncpa [#allocation3], 1 }
  0x39   :  { %58 = vsyncpa [#allocation6], 1 }
  0x3a   :  { %59 = vsyncpa [#allocation4], 1 }

</bundles_post_ra>
